<compile_context>
chip_gen: v7x
topology: tpu7x:2x2x1
jax: 0.10.0
libtpu: 0.0.40
codegen_flags: <defaults>
</compile_context>

<pallas_src>
import functools

import jax
import jax.numpy as jnp
from jax import lax
from jax.experimental import pallas as pl
from jax.experimental.pallas import tpu as pltpu

EPS = 1e-3  # BatchNorm1d eps used by the module


def _residual_block_kernel(x0pT_ref, x1dT_ref, w1f_ref, b1_ref, w2c_ref,
                           wskipT_ref, mean_ref, inv_ref,
                           o0_ref, o1_ref,
                           p1_ref, yp_ref, p2_ref,
                           *, K, Cin, Cout, L, Lout, ds, pad2, Lp2):
    # ---- conv_1 (k=17, 'same') + folded BN1 + ReLU as ONE im2col matmul ----
    # p1[t, k*Cin:(k+1)*Cin] = x0_padded[t + k, :]  (channel-last layout)
    for k in range(K):
        p1_ref[:, k * Cin:(k + 1) * Cin] = x0pT_ref[0, k:k + L, :]
    y = jnp.dot(p1_ref[...], w1f_ref[...], preferred_element_type=jnp.float32)
    y = jnp.maximum(y + b1_ref[...], 0.0)                      # [L, Cout]
    # TODO(synk): nn.Dropout(p=0.2) is identity in inference mode; training-mode
    # masking would need pltpu.prng_seed / pltpu.prng_random_bits.

    # ---- conv_2 (k=17, pad=7, stride=ds) as ONE im2col matmul ----
    # Zero-pad y by 7 rows on each side in VMEM, then gather the K strided row
    # slabs (stride ds on the sublane axis) into the [Lout, K*Cout] patch.
    yp_ref[...] = jnp.zeros((Lp2, Cout), jnp.float32)
    yp_ref[pad2:pad2 + L, :] = y
    for k in range(K):
        p2_ref[:, k * Cout:(k + 1) * Cout] = yp_ref[pl.ds(k, Lout, ds), :]
    z = jnp.dot(p2_ref[...], w2c_ref[...], preferred_element_type=jnp.float32)  # [Lout, Cout]

    # ---- skip path (MaxPool1d(1, ds) already applied in the wrapper) ----
    skip = jnp.dot(x1dT_ref[0], wskipT_ref[...], preferred_element_type=jnp.float32)

    # ---- residual add + second bn_act (shared BN running stats, pre_act=True) ----
    x1_out = z + skip
    x0_out = jnp.maximum((x1_out - mean_ref[...]) * inv_ref[...], 0.0)
    o0_ref[0] = x0_out
    o1_ref[0] = x1_out


def residual_block_forward(x0, x1, params, n_samples_out):
    w_skip, w1, w2, run_mean, run_var = params
    B, Cin, L = x0.shape
    Cout, _, K = w1.shape
    ds = L // n_samples_out
    assert ds >= 1
    pad1 = (K - 1) // 2                            # conv_1 'same' padding (K odd)
    pad2 = 7                                       # conv_2 padding from the module
    Lout_skip = (L - 1) // ds + 1                  # MaxPool1d(1, stride=ds) output len
    Lout = (L + 2 * pad2 - K) // ds + 1            # conv_2 output len
    assert Lout_skip == Lout, "branch lengths must match for the residual add"
    Lp = L + 2 * pad1
    Lp2 = L + 2 * pad2

    f32 = jnp.float32
    mean = run_mean.astype(f32)
    inv = 1.0 / jnp.sqrt(run_var.astype(f32) + EPS)

    # ---- wrapper-side glue (plain JAX on HBM): layout + BN folding ----
    # Channel-last layout: length on sublanes, channels on lanes.
    x0pT = jnp.transpose(jnp.pad(x0.astype(f32), ((0, 0), (0, 0), (pad1, pad1))),
                         (0, 2, 1))                                 # [B, Lp, Cin]
    x1dT = jnp.transpose(x1.astype(f32)[:, :, ::ds], (0, 2, 1))     # [B, Lout, Cin]

    w1c = jnp.transpose(w1.astype(f32), (2, 1, 0)).reshape(K * Cin, Cout)
    w1f = w1c * inv[None, :]                                        # BN1 scale folded
    b1 = (-mean * inv)[None, :]                                     # BN1 shift folded
    w2c = jnp.transpose(w2.astype(f32), (2, 1, 0)).reshape(K * Cout, Cout)
    wskipT = jnp.transpose(w_skip.astype(f32)[:, :, 0], (1, 0))     # [Cin, Cout]
    mean_row = mean[None, :]
    inv_row = inv[None, :]

    kernel = functools.partial(_residual_block_kernel, K=K, Cin=Cin, Cout=Cout,
                               L=L, Lout=Lout, ds=ds, pad2=pad2, Lp2=Lp2)

    grid_spec = pltpu.PrefetchScalarGridSpec(
        num_scalar_prefetch=0,
        grid=(B,),
        in_specs=[
            pl.BlockSpec((1, Lp, Cin), lambda b: (b, 0, 0)),        # x0 (padded, ch-last)
            pl.BlockSpec((1, Lout, Cin), lambda b: (b, 0, 0)),      # x1 subsampled (ch-last)
            pl.BlockSpec((K * Cin, Cout), lambda b: (0, 0)),        # conv_1 weight (BN folded)
            pl.BlockSpec((1, Cout), lambda b: (0, 0)),              # folded BN1 bias
            pl.BlockSpec((K * Cout, Cout), lambda b: (0, 0)),       # conv_2 weight
            pl.BlockSpec((Cin, Cout), lambda b: (0, 0)),            # conv_skip weight
            pl.BlockSpec((1, Cout), lambda b: (0, 0)),              # BN running mean
            pl.BlockSpec((1, Cout), lambda b: (0, 0)),              # 1/sqrt(var+eps)
        ],
        out_specs=[
            pl.BlockSpec((1, Lout, Cout), lambda b: (b, 0, 0)),
            pl.BlockSpec((1, Lout, Cout), lambda b: (b, 0, 0)),
        ],
        scratch_shapes=[
            pltpu.VMEM((L, K * Cin), f32),       # conv_1 im2col patch
            pltpu.VMEM((Lp2, Cout), f32),        # zero-padded y
            pltpu.VMEM((Lout, K * Cout), f32),   # conv_2 im2col patch
        ],
    )

    out_shape = (jax.ShapeDtypeStruct((B, Lout, Cout), f32),
                 jax.ShapeDtypeStruct((B, Lout, Cout), f32))

    o0T, o1T = pl.pallas_call(
        kernel,
        out_shape=out_shape,
        grid_spec=grid_spec,
        compiler_params=pltpu.CompilerParams(
            dimension_semantics=("parallel",),
            vmem_limit_bytes=32 * 1024 * 1024),
    )(x0pT, x1dT, w1f, b1, w2c, wskipT, mean_row, inv_row)

    # Back to the module's NCL layout.
    return jnp.transpose(o0T, (0, 2, 1)), jnp.transpose(o1T, (0, 2, 1))


def residual_block_reference(x0, x1, params, n_samples_out):
    """Pure-JAX reference mirroring the PyTorch forward (inference mode)."""
    w_skip, w1, w2, run_mean, run_var = params
    L = x1.shape[2]
    K = w1.shape[2]
    ds = L // n_samples_out
    dn = ('NCH', 'OIH', 'NCH')

    def bn_relu(v):
        return jax.nn.relu((v - run_mean[None, :, None]) /
                           jnp.sqrt(run_var[None, :, None] + EPS))

    x1d = x1[:, :, ::ds]                                                     # MaxPool1d(1, ds)
    x1d = lax.conv_general_dilated(x1d, w_skip, (1,), [(0, 0)],
                                   dimension_numbers=dn)                     # conv_skip
    y = lax.conv_general_dilated(x0, w1, (1,), [((K - 1) // 2, (K - 1) // 2)],
                                 dimension_numbers=dn)                       # conv_1 'same'
    y = bn_relu(y)
    z = lax.conv_general_dilated(y, w2, (ds,), [(7, 7)],
                                 dimension_numbers=dn)                       # conv_2
    x1_out = z + x1d
    x0_out = bn_relu(x1_out)
    return x0_out, x1_out


if __name__ == "__main__":
    B, Cin, Cout, L, K = 2, 4, 8, 16, 17
    n_samples_out = 4   # down_sample = 16 // 4 = 4

    key = jax.random.PRNGKey(0)
    ks = jax.random.split(key, 7)
    x0 = jax.random.normal(ks[0], (B, Cin, L), jnp.float32)
    x1 = jax.random.normal(ks[1], (B, Cin, L), jnp.float32)
    # Deterministic synthetic parameters matching the module's __init__ shapes:
    w_skip = jax.random.normal(ks[2], (Cout, Cin, 1), jnp.float32) * 0.3     # conv_skip
    w1 = jax.random.normal(ks[3], (Cout, Cin, K), jnp.float32) * 0.1         # conv_1
    w2 = jax.random.normal(ks[4], (Cout, Cout, K), jnp.float32) * 0.1        # conv_2
    run_mean = jax.random.normal(ks[5], (Cout,), jnp.float32) * 0.1          # BN running mean
    run_var = jax.random.uniform(ks[6], (Cout,), jnp.float32,
                                 minval=0.5, maxval=1.5)                     # BN running var
    params = (w_skip, w1, w2, run_mean, run_var)

    out0, out1 = residual_block_forward(x0, x1, params, n_samples_out)
    jax.block_until_ready((out0, out1))

    ref0, ref1 = residual_block_reference(x0, x1, params, n_samples_out)
    assert out0.shape == (B, Cout, n_samples_out)
    assert out1.shape == (B, Cout, n_samples_out)
    assert jnp.allclose(out0, ref0, atol=1e-3, rtol=1e-3)
    assert jnp.allclose(out1, ref1, atol=1e-3, rtol=1e-3)
    print("KERNEL_OK")
</pallas_src>

<mosaic_0001>
module attributes {stable_mosaic.version = 11 : i64} {
  func.func @_residual_block_kernel(%arg0: i32, %arg1: memref<1x32x4xf32, #tpu.memory_space<vmem>>, %arg2: memref<1x4x4xf32, #tpu.memory_space<vmem>>, %arg3: memref<68x8xf32, #tpu.memory_space<vmem>>, %arg4: memref<1x8xf32, #tpu.memory_space<vmem>>, %arg5: memref<136x8xf32, #tpu.memory_space<vmem>>, %arg6: memref<4x8xf32, #tpu.memory_space<vmem>>, %arg7: memref<1x8xf32, #tpu.memory_space<vmem>>, %arg8: memref<1x8xf32, #tpu.memory_space<vmem>>, %arg9: memref<1x4x8xf32, #tpu.memory_space<vmem>>, %arg10: memref<1x4x8xf32, #tpu.memory_space<vmem>>, %arg11: memref<16x68xf32, #tpu.memory_space<vmem>>, %arg12: memref<30x8xf32, #tpu.memory_space<vmem>>, %arg13: memref<4x136xf32, #tpu.memory_space<vmem>>) attributes {dimension_semantics = [#tpu.dimension_semantics<parallel>], iteration_bounds = array<i64: 2>, scalar_prefetch = 0 : i64, scratch_operands = 3 : i64, tpu.core_type = #tpu.core_type<tc>, window_params = [{transform_indices = @transform_0, window_bounds = array<i64: 1, 32, 4>}, {transform_indices = @transform_1, window_bounds = array<i64: 1, 4, 4>}, {pipeline_mode = #tpu.pipeline_mode<synchronous>, transform_indices = @transform_2, window_bounds = array<i64: 68, 8>}, {pipeline_mode = #tpu.pipeline_mode<synchronous>, transform_indices = @transform_3, window_bounds = array<i64: 1, 8>}, {pipeline_mode = #tpu.pipeline_mode<synchronous>, transform_indices = @transform_4, window_bounds = array<i64: 136, 8>}, {pipeline_mode = #tpu.pipeline_mode<synchronous>, transform_indices = @transform_5, window_bounds = array<i64: 4, 8>}, {pipeline_mode = #tpu.pipeline_mode<synchronous>, transform_indices = @transform_6, window_bounds = array<i64: 1, 8>}, {pipeline_mode = #tpu.pipeline_mode<synchronous>, transform_indices = @transform_7, window_bounds = array<i64: 1, 8>}, {transform_indices = @transform_8, window_bounds = array<i64: 1, 4, 8>}, {transform_indices = @transform_9, window_bounds = array<i64: 1, 4, 8>}]} {
    %c0 = arith.constant 0 : index
    %c0_0 = arith.constant 0 : index
    %c0_1 = arith.constant 0 : index
    %0 = vector.load %arg1[%c0, %c0_0, %c0_1] : memref<1x32x4xf32, #tpu.memory_space<vmem>>, vector<1x16x4xf32>
    %1 = vector.shape_cast %0 : vector<1x16x4xf32> to vector<16x4xf32>
    %c0_2 = arith.constant 0 : index
    %c0_3 = arith.constant 0 : index
    %2 = vector.load %arg11[%c0_2, %c0_3] : memref<16x68xf32, #tpu.memory_space<vmem>>, vector<16x4xf32>
    tpu.vector_store %arg11[%c0_2, %c0_3], %1 {strides = array<i32>} : memref<16x68xf32, #tpu.memory_space<vmem>>, vector<16x4xf32>,
    %c0_4 = arith.constant 0 : index
    %c1 = arith.constant 1 : index
    %c0_5 = arith.constant 0 : index
    %3 = vector.load %arg1[%c0_4, %c1, %c0_5] : memref<1x32x4xf32, #tpu.memory_space<vmem>>, vector<1x16x4xf32>
    %4 = vector.shape_cast %3 : vector<1x16x4xf32> to vector<16x4xf32>
    %c0_6 = arith.constant 0 : index
    %c4 = arith.constant 4 : index
    %5 = vector.load %arg11[%c0_6, %c4] : memref<16x68xf32, #tpu.memory_space<vmem>>, vector<16x4xf32>
    tpu.vector_store %arg11[%c0_6, %c4], %4 {strides = array<i32>} : memref<16x68xf32, #tpu.memory_space<vmem>>, vector<16x4xf32>,
    %c0_7 = arith.constant 0 : index
    %c2 = arith.constant 2 : index
    %c0_8 = arith.constant 0 : index
    %6 = vector.load %arg1[%c0_7, %c2, %c0_8] : memref<1x32x4xf32, #tpu.memory_space<vmem>>, vector<1x16x4xf32>
    %7 = vector.shape_cast %6 : vector<1x16x4xf32> to vector<16x4xf32>
    %c0_9 = arith.constant 0 : index
    %c8 = arith.constant 8 : index
    %8 = vector.load %arg11[%c0_9, %c8] : memref<16x68xf32, #tpu.memory_space<vmem>>, vector<16x4xf32>
    tpu.vector_store %arg11[%c0_9, %c8], %7 {strides = array<i32>} : memref<16x68xf32, #tpu.memory_space<vmem>>, vector<16x4xf32>,
    %c0_10 = arith.constant 0 : index
    %c3 = arith.constant 3 : index
    %c0_11 = arith.constant 0 : index
    %9 = vector.load %arg1[%c0_10, %c3, %c0_11] : memref<1x32x4xf32, #tpu.memory_space<vmem>>, vector<1x16x4xf32>
    %10 = vector.shape_cast %9 : vector<1x16x4xf32> to vector<16x4xf32>
    %c0_12 = arith.constant 0 : index
    %c12 = arith.constant 12 : index
    %11 = vector.load %arg11[%c0_12, %c12] : memref<16x68xf32, #tpu.memory_space<vmem>>, vector<16x4xf32>
    tpu.vector_store %arg11[%c0_12, %c12], %10 {strides = array<i32>} : memref<16x68xf32, #tpu.memory_space<vmem>>, vector<16x4xf32>,
    %c0_13 = arith.constant 0 : index
    %c4_14 = arith.constant 4 : index
    %c0_15 = arith.constant 0 : index
    %12 = vector.load %arg1[%c0_13, %c4_14, %c0_15] : memref<1x32x4xf32, #tpu.memory_space<vmem>>, vector<1x16x4xf32>
    %13 = vector.shape_cast %12 : vector<1x16x4xf32> to vector<16x4xf32>
    %c0_16 = arith.constant 0 : index
    %c16 = arith.constant 16 : index
    %14 = vector.load %arg11[%c0_16, %c16] : memref<16x68xf32, #tpu.memory_space<vmem>>, vector<16x4xf32>
    tpu.vector_store %arg11[%c0_16, %c16], %13 {strides = array<i32>} : memref<16x68xf32, #tpu.memory_space<vmem>>, vector<16x4xf32>,
    %c0_17 = arith.constant 0 : index
    %c5 = arith.constant 5 : index
    %c0_18 = arith.constant 0 : index
    %15 = vector.load %arg1[%c0_17, %c5, %c0_18] : memref<1x32x4xf32, #tpu.memory_space<vmem>>, vector<1x16x4xf32>
    %16 = vector.shape_cast %15 : vector<1x16x4xf32> to vector<16x4xf32>
    %c0_19 = arith.constant 0 : index
    %c20 = arith.constant 20 : index
    %17 = vector.load %arg11[%c0_19, %c20] : memref<16x68xf32, #tpu.memory_space<vmem>>, vector<16x4xf32>
    tpu.vector_store %arg11[%c0_19, %c20], %16 {strides = array<i32>} : memref<16x68xf32, #tpu.memory_space<vmem>>, vector<16x4xf32>,
    %c0_20 = arith.constant 0 : index
    %c6 = arith.constant 6 : index
    %c0_21 = arith.constant 0 : index
    %18 = vector.load %arg1[%c0_20, %c6, %c0_21] : memref<1x32x4xf32, #tpu.memory_space<vmem>>, vector<1x16x4xf32>
    %19 = vector.shape_cast %18 : vector<1x16x4xf32> to vector<16x4xf32>
    %c0_22 = arith.constant 0 : index
    %c24 = arith.constant 24 : index
    %20 = vector.load %arg11[%c0_22, %c24] : memref<16x68xf32, #tpu.memory_space<vmem>>, vector<16x4xf32>
    tpu.vector_store %arg11[%c0_22, %c24], %19 {strides = array<i32>} : memref<16x68xf32, #tpu.memory_space<vmem>>, vector<16x4xf32>,
    %c0_23 = arith.constant 0 : index
    %c7 = arith.constant 7 : index
    %c0_24 = arith.constant 0 : index
    %21 = vector.load %arg1[%c0_23, %c7, %c0_24] : memref<1x32x4xf32, #tpu.memory_space<vmem>>, vector<1x16x4xf32>
    %22 = vector.shape_cast %21 : vector<1x16x4xf32> to vector<16x4xf32>
    %c0_25 = arith.constant 0 : index
    %c28 = arith.constant 28 : index
    %23 = vector.load %arg11[%c0_25, %c28] : memref<16x68xf32, #tpu.memory_space<vmem>>, vector<16x4xf32>
    tpu.vector_store %arg11[%c0_25, %c28], %22 {strides = array<i32>} : memref<16x68xf32, #tpu.memory_space<vmem>>, vector<16x4xf32>,
    %c0_26 = arith.constant 0 : index
    %c8_27 = arith.constant 8 : index
    %c0_28 = arith.constant 0 : index
    %24 = vector.load %arg1[%c0_26, %c8_27, %c0_28] : memref<1x32x4xf32, #tpu.memory_space<vmem>>, vector<1x16x4xf32>
    %25 = vector.shape_cast %24 : vector<1x16x4xf32> to vector<16x4xf32>
    %c0_29 = arith.constant 0 : index
    %c32 = arith.constant 32 : index
    %26 = vector.load %arg11[%c0_29, %c32] : memref<16x68xf32, #tpu.memory_space<vmem>>, vector<16x4xf32>
    tpu.vector_store %arg11[%c0_29, %c32], %25 {strides = array<i32>} : memref<16x68xf32, #tpu.memory_space<vmem>>, vector<16x4xf32>,
    %c0_30 = arith.constant 0 : index
    %c9 = arith.constant 9 : index
    %c0_31 = arith.constant 0 : index
    %27 = vector.load %arg1[%c0_30, %c9, %c0_31] : memref<1x32x4xf32, #tpu.memory_space<vmem>>, vector<1x16x4xf32>
    %28 = vector.shape_cast %27 : vector<1x16x4xf32> to vector<16x4xf32>
    %c0_32 = arith.constant 0 : index
    %c36 = arith.constant 36 : index
    %29 = vector.load %arg11[%c0_32, %c36] : memref<16x68xf32, #tpu.memory_space<vmem>>, vector<16x4xf32>
    tpu.vector_store %arg11[%c0_32, %c36], %28 {strides = array<i32>} : memref<16x68xf32, #tpu.memory_space<vmem>>, vector<16x4xf32>,
    %c0_33 = arith.constant 0 : index
    %c10 = arith.constant 10 : index
    %c0_34 = arith.constant 0 : index
    %30 = vector.load %arg1[%c0_33, %c10, %c0_34] : memref<1x32x4xf32, #tpu.memory_space<vmem>>, vector<1x16x4xf32>
    %31 = vector.shape_cast %30 : vector<1x16x4xf32> to vector<16x4xf32>
    %c0_35 = arith.constant 0 : index
    %c40 = arith.constant 40 : index
    %32 = vector.load %arg11[%c0_35, %c40] : memref<16x68xf32, #tpu.memory_space<vmem>>, vector<16x4xf32>
    tpu.vector_store %arg11[%c0_35, %c40], %31 {strides = array<i32>} : memref<16x68xf32, #tpu.memory_space<vmem>>, vector<16x4xf32>,
    %c0_36 = arith.constant 0 : index
    %c11 = arith.constant 11 : index
    %c0_37 = arith.constant 0 : index
    %33 = vector.load %arg1[%c0_36, %c11, %c0_37] : memref<1x32x4xf32, #tpu.memory_space<vmem>>, vector<1x16x4xf32>
    %34 = vector.shape_cast %33 : vector<1x16x4xf32> to vector<16x4xf32>
    %c0_38 = arith.constant 0 : index
    %c44 = arith.constant 44 : index
    %35 = vector.load %arg11[%c0_38, %c44] : memref<16x68xf32, #tpu.memory_space<vmem>>, vector<16x4xf32>
    tpu.vector_store %arg11[%c0_38, %c44], %34 {strides = array<i32>} : memref<16x68xf32, #tpu.memory_space<vmem>>, vector<16x4xf32>,
    %c0_39 = arith.constant 0 : index
    %c12_40 = arith.constant 12 : index
    %c0_41 = arith.constant 0 : index
    %36 = vector.load %arg1[%c0_39, %c12_40, %c0_41] : memref<1x32x4xf32, #tpu.memory_space<vmem>>, vector<1x16x4xf32>
    %37 = vector.shape_cast %36 : vector<1x16x4xf32> to vector<16x4xf32>
    %c0_42 = arith.constant 0 : index
    %c48 = arith.constant 48 : index
    %38 = vector.load %arg11[%c0_42, %c48] : memref<16x68xf32, #tpu.memory_space<vmem>>, vector<16x4xf32>
    tpu.vector_store %arg11[%c0_42, %c48], %37 {strides = array<i32>} : memref<16x68xf32, #tpu.memory_space<vmem>>, vector<16x4xf32>,
    %c0_43 = arith.constant 0 : index
    %c13 = arith.constant 13 : index
    %c0_44 = arith.constant 0 : index
    %39 = vector.load %arg1[%c0_43, %c13, %c0_44] : memref<1x32x4xf32, #tpu.memory_space<vmem>>, vector<1x16x4xf32>
    %40 = vector.shape_cast %39 : vector<1x16x4xf32> to vector<16x4xf32>
    %c0_45 = arith.constant 0 : index
    %c52 = arith.constant 52 : index
    %41 = vector.load %arg11[%c0_45, %c52] : memref<16x68xf32, #tpu.memory_space<vmem>>, vector<16x4xf32>
    tpu.vector_store %arg11[%c0_45, %c52], %40 {strides = array<i32>} : memref<16x68xf32, #tpu.memory_space<vmem>>, vector<16x4xf32>,
    %c0_46 = arith.constant 0 : index
    %c14 = arith.constant 14 : index
    %c0_47 = arith.constant 0 : index
    %42 = vector.load %arg1[%c0_46, %c14, %c0_47] : memref<1x32x4xf32, #tpu.memory_space<vmem>>, vector<1x16x4xf32>
    %43 = vector.shape_cast %42 : vector<1x16x4xf32> to vector<16x4xf32>
    %c0_48 = arith.constant 0 : index
    %c56 = arith.constant 56 : index
    %44 = vector.load %arg11[%c0_48, %c56] : memref<16x68xf32, #tpu.memory_space<vmem>>, vector<16x4xf32>
    tpu.vector_store %arg11[%c0_48, %c56], %43 {strides = array<i32>} : memref<16x68xf32, #tpu.memory_space<vmem>>, vector<16x4xf32>,
    %c0_49 = arith.constant 0 : index
    %c15 = arith.constant 15 : index
    %c0_50 = arith.constant 0 : index
    %45 = vector.load %arg1[%c0_49, %c15, %c0_50] : memref<1x32x4xf32, #tpu.memory_space<vmem>>, vector<1x16x4xf32>
    %46 = vector.shape_cast %45 : vector<1x16x4xf32> to vector<16x4xf32>
    %c0_51 = arith.constant 0 : index
    %c60 = arith.constant 60 : index
    %47 = vector.load %arg11[%c0_51, %c60] : memref<16x68xf32, #tpu.memory_space<vmem>>, vector<16x4xf32>
    tpu.vector_store %arg11[%c0_51, %c60], %46 {strides = array<i32>} : memref<16x68xf32, #tpu.memory_space<vmem>>, vector<16x4xf32>,
    %c0_52 = arith.constant 0 : index
    %c16_53 = arith.constant 16 : index
    %c0_54 = arith.constant 0 : index
    %48 = vector.load %arg1[%c0_52, %c16_53, %c0_54] : memref<1x32x4xf32, #tpu.memory_space<vmem>>, vector<1x16x4xf32>
    %49 = vector.shape_cast %48 : vector<1x16x4xf32> to vector<16x4xf32>
    %c0_55 = arith.constant 0 : index
    %c64 = arith.constant 64 : index
    %50 = vector.load %arg11[%c0_55, %c64] : memref<16x68xf32, #tpu.memory_space<vmem>>, vector<16x4xf32>
    tpu.vector_store %arg11[%c0_55, %c64], %49 {strides = array<i32>} : memref<16x68xf32, #tpu.memory_space<vmem>>, vector<16x4xf32>,
    %c0_56 = arith.constant 0 : index
    %c0_57 = arith.constant 0 : index
    %51 = vector.load %arg11[%c0_56, %c0_57] : memref<16x68xf32, #tpu.memory_space<vmem>>, vector<16x68xf32>
    %c0_58 = arith.constant 0 : index
    %c0_59 = arith.constant 0 : index
    %52 = vector.load %arg3[%c0_58, %c0_59] : memref<68x8xf32, #tpu.memory_space<vmem>>, vector<68x8xf32>
    %cst = arith.constant dense<0.000000e+00> : vector<16x8xf32>
    %53 = tpu.matmul %51, %52, %cst {dimension_numbers = #tpu.dot_dimension_numbers<[1], [0], [0], [1], [0, 0, 1, 1], [], []>} : vector<16x68xf32>, vector<68x8xf32>, vector<16x8xf32> -> vector<16x8xf32>
    %c0_60 = arith.constant 0 : index
    %c0_61 = arith.constant 0 : index
    %54 = vector.load %arg4[%c0_60, %c0_61] : memref<1x8xf32, #tpu.memory_space<vmem>>, vector<1x8xf32>
    %55 = vector.broadcast %54 : vector<1x8xf32> to vector<16x8xf32>
    %56 = arith.addf %53, %55 : vector<16x8xf32>
    %cst_62 = arith.constant 0.000000e+00 : f32
    %57 = vector.broadcast %cst_62 : f32 to vector<16x8xf32>
    %58 = arith.maximumf %56, %57 : vector<16x8xf32>
    %cst_63 = arith.constant 0.000000e+00 : f32
    %59 = vector.broadcast %cst_63 : f32 to vector<30x8xf32>
    %c0_64 = arith.constant 0 : index
    %c0_65 = arith.constant 0 : index
    %60 = vector.load %arg12[%c0_64, %c0_65] : memref<30x8xf32, #tpu.memory_space<vmem>>, vector<30x8xf32>
    tpu.vector_store %arg12[%c0_64, %c0_65], %59 {strides = array<i32>} : memref<30x8xf32, #tpu.memory_space<vmem>>, vector<30x8xf32>,
    %c7_66 = arith.constant 7 : index
    %c0_67 = arith.constant 0 : index
    %61 = vector.load %arg12[%c7_66, %c0_67] : memref<30x8xf32, #tpu.memory_space<vmem>>, vector<16x8xf32>
    tpu.vector_store %arg12[%c7_66, %c0_67], %58 {strides = array<i32>} : memref<30x8xf32, #tpu.memory_space<vmem>>, vector<16x8xf32>,
    %c0_68 = arith.constant 0 : index
    %c0_69 = arith.constant 0 : index
    %62 = tpu.strided_load %arg12[%c0_68, %c0_69] {strides = array<i32: 4, 1>} : memref<30x8xf32, #tpu.memory_space<vmem>>, vector<4x8xf32>
    %c0_70 = arith.constant 0 : index
    %c0_71 = arith.constant 0 : index
    %63 = vector.load %arg13[%c0_70, %c0_71] : memref<4x136xf32, #tpu.memory_space<vmem>>, vector<4x8xf32>
    tpu.vector_store %arg13[%c0_70, %c0_71], %62 {strides = array<i32>} : memref<4x136xf32, #tpu.memory_space<vmem>>, vector<4x8xf32>,
    %c1_72 = arith.constant 1 : index
    %c0_73 = arith.constant 0 : index
    %64 = tpu.strided_load %arg12[%c1_72, %c0_73] {strides = array<i32: 4, 1>} : memref<30x8xf32, #tpu.memory_space<vmem>>, vector<4x8xf32>
    %c0_74 = arith.constant 0 : index
    %c8_75 = arith.constant 8 : index
    %65 = vector.load %arg13[%c0_74, %c8_75] : memref<4x136xf32, #tpu.memory_space<vmem>>, vector<4x8xf32>
    tpu.vector_store %arg13[%c0_74, %c8_75], %64 {strides = array<i32>} : memref<4x136xf32, #tpu.memory_space<vmem>>, vector<4x8xf32>,
    %c2_76 = arith.constant 2 : index
    %c0_77 = arith.constant 0 : index
    %66 = tpu.strided_load %arg12[%c2_76, %c0_77] {strides = array<i32: 4, 1>} : memref<30x8xf32, #tpu.memory_space<vmem>>, vector<4x8xf32>
    %c0_78 = arith.constant 0 : index
    %c16_79 = arith.constant 16 : index
    %67 = vector.load %arg13[%c0_78, %c16_79] : memref<4x136xf32, #tpu.memory_space<vmem>>, vector<4x8xf32>
    tpu.vector_store %arg13[%c0_78, %c16_79], %66 {strides = array<i32>} : memref<4x136xf32, #tpu.memory_space<vmem>>, vector<4x8xf32>,
    %c3_80 = arith.constant 3 : index
    %c0_81 = arith.constant 0 : index
    %68 = tpu.strided_load %arg12[%c3_80, %c0_81] {strides = array<i32: 4, 1>} : memref<30x8xf32, #tpu.memory_space<vmem>>, vector<4x8xf32>
    %c0_82 = arith.constant 0 : index
    %c24_83 = arith.constant 24 : index
    %69 = vector.load %arg13[%c0_82, %c24_83] : memref<4x136xf32, #tpu.memory_space<vmem>>, vector<4x8xf32>
    tpu.vector_store %arg13[%c0_82, %c24_83], %68 {strides = array<i32>} : memref<4x136xf32, #tpu.memory_space<vmem>>, vector<4x8xf32>,
    %c4_84 = arith.constant 4 : index
    %c0_85 = arith.constant 0 : index
    %70 = tpu.strided_load %arg12[%c4_84, %c0_85] {strides = array<i32: 4, 1>} : memref<30x8xf32, #tpu.memory_space<vmem>>, vector<4x8xf32>
    %c0_86 = arith.constant 0 : index
    %c32_87 = arith.constant 32 : index
    %71 = vector.load %arg13[%c0_86, %c32_87] : memref<4x136xf32, #tpu.memory_space<vmem>>, vector<4x8xf32>
    tpu.vector_store %arg13[%c0_86, %c32_87], %70 {strides = array<i32>} : memref<4x136xf32, #tpu.memory_space<vmem>>, vector<4x8xf32>,
    %c5_88 = arith.constant 5 : index
    %c0_89 = arith.constant 0 : index
    %72 = tpu.strided_load %arg12[%c5_88, %c0_89] {strides = array<i32: 4, 1>} : memref<30x8xf32, #tpu.memory_space<vmem>>, vector<4x8xf32>
    %c0_90 = arith.constant 0 : index
    %c40_91 = arith.constant 40 : index
    %73 = vector.load %arg13[%c0_90, %c40_91] : memref<4x136xf32, #tpu.memory_space<vmem>>, vector<4x8xf32>
    tpu.vector_store %arg13[%c0_90, %c40_91], %72 {strides = array<i32>} : memref<4x136xf32, #tpu.memory_space<vmem>>, vector<4x8xf32>,
    %c6_92 = arith.constant 6 : index
    %c0_93 = arith.constant 0 : index
    %74 = tpu.strided_load %arg12[%c6_92, %c0_93] {strides = array<i32: 4, 1>} : memref<30x8xf32, #tpu.memory_space<vmem>>, vector<4x8xf32>
    %c0_94 = arith.constant 0 : index
    %c48_95 = arith.constant 48 : index
    %75 = vector.load %arg13[%c0_94, %c48_95] : memref<4x136xf32, #tpu.memory_space<vmem>>, vector<4x8xf32>
    tpu.vector_store %arg13[%c0_94, %c48_95], %74 {strides = array<i32>} : memref<4x136xf32, #tpu.memory_space<vmem>>, vector<4x8xf32>,
    %c7_96 = arith.constant 7 : index
    %c0_97 = arith.constant 0 : index
    %76 = tpu.strided_load %arg12[%c7_96, %c0_97] {strides = array<i32: 4, 1>} : memref<30x8xf32, #tpu.memory_space<vmem>>, vector<4x8xf32>
    %c0_98 = arith.constant 0 : index
    %c56_99 = arith.constant 56 : index
    %77 = vector.load %arg13[%c0_98, %c56_99] : memref<4x136xf32, #tpu.memory_space<vmem>>, vector<4x8xf32>
    tpu.vector_store %arg13[%c0_98, %c56_99], %76 {strides = array<i32>} : memref<4x136xf32, #tpu.memory_space<vmem>>, vector<4x8xf32>,
    %c8_100 = arith.constant 8 : index
    %c0_101 = arith.constant 0 : index
    %78 = tpu.strided_load %arg12[%c8_100, %c0_101] {strides = array<i32: 4, 1>} : memref<30x8xf32, #tpu.memory_space<vmem>>, vector<4x8xf32>
    %c0_102 = arith.constant 0 : index
    %c64_103 = arith.constant 64 : index
    %79 = vector.load %arg13[%c0_102, %c64_103] : memref<4x136xf32, #tpu.memory_space<vmem>>, vector<4x8xf32>
    tpu.vector_store %arg13[%c0_102, %c64_103], %78 {strides = array<i32>} : memref<4x136xf32, #tpu.memory_space<vmem>>, vector<4x8xf32>,
    %c9_104 = arith.constant 9 : index
    %c0_105 = arith.constant 0 : index
    %80 = tpu.strided_load %arg12[%c9_104, %c0_105] {strides = array<i32: 4, 1>} : memref<30x8xf32, #tpu.memory_space<vmem>>, vector<4x8xf32>
    %c0_106 = arith.constant 0 : index
    %c72 = arith.constant 72 : index
    %81 = vector.load %arg13[%c0_106, %c72] : memref<4x136xf32, #tpu.memory_space<vmem>>, vector<4x8xf32>
    tpu.vector_store %arg13[%c0_106, %c72], %80 {strides = array<i32>} : memref<4x136xf32, #tpu.memory_space<vmem>>, vector<4x8xf32>,
    %c10_107 = arith.constant 10 : index
    %c0_108 = arith.constant 0 : index
    %82 = tpu.strided_load %arg12[%c10_107, %c0_108] {strides = array<i32: 4, 1>} : memref<30x8xf32, #tpu.memory_space<vmem>>, vector<4x8xf32>
    %c0_109 = arith.constant 0 : index
    %c80 = arith.constant 80 : index
    %83 = vector.load %arg13[%c0_109, %c80] : memref<4x136xf32, #tpu.memory_space<vmem>>, vector<4x8xf32>
    tpu.vector_store %arg13[%c0_109, %c80], %82 {strides = array<i32>} : memref<4x136xf32, #tpu.memory_space<vmem>>, vector<4x8xf32>,
    %c11_110 = arith.constant 11 : index
    %c0_111 = arith.constant 0 : index
    %84 = tpu.strided_load %arg12[%c11_110, %c0_111] {strides = array<i32: 4, 1>} : memref<30x8xf32, #tpu.memory_space<vmem>>, vector<4x8xf32>
    %c0_112 = arith.constant 0 : index
    %c88 = arith.constant 88 : index
    %85 = vector.load %arg13[%c0_112, %c88] : memref<4x136xf32, #tpu.memory_space<vmem>>, vector<4x8xf32>
    tpu.vector_store %arg13[%c0_112, %c88], %84 {strides = array<i32>} : memref<4x136xf32, #tpu.memory_space<vmem>>, vector<4x8xf32>,
    %c12_113 = arith.constant 12 : index
    %c0_114 = arith.constant 0 : index
    %86 = tpu.strided_load %arg12[%c12_113, %c0_114] {strides = array<i32: 4, 1>} : memref<30x8xf32, #tpu.memory_space<vmem>>, vector<4x8xf32>
    %c0_115 = arith.constant 0 : index
    %c96 = arith.constant 96 : index
    %87 = vector.load %arg13[%c0_115, %c96] : memref<4x136xf32, #tpu.memory_space<vmem>>, vector<4x8xf32>
    tpu.vector_store %arg13[%c0_115, %c96], %86 {strides = array<i32>} : memref<4x136xf32, #tpu.memory_space<vmem>>, vector<4x8xf32>,
    %c13_116 = arith.constant 13 : index
    %c0_117 = arith.constant 0 : index
    %88 = tpu.strided_load %arg12[%c13_116, %c0_117] {strides = array<i32: 4, 1>} : memref<30x8xf32, #tpu.memory_space<vmem>>, vector<4x8xf32>
    %c0_118 = arith.constant 0 : index
    %c104 = arith.constant 104 : index
    %89 = vector.load %arg13[%c0_118, %c104] : memref<4x136xf32, #tpu.memory_space<vmem>>, vector<4x8xf32>
    tpu.vector_store %arg13[%c0_118, %c104], %88 {strides = array<i32>} : memref<4x136xf32, #tpu.memory_space<vmem>>, vector<4x8xf32>,
    %c14_119 = arith.constant 14 : index
    %c0_120 = arith.constant 0 : index
    %90 = tpu.strided_load %arg12[%c14_119, %c0_120] {strides = array<i32: 4, 1>} : memref<30x8xf32, #tpu.memory_space<vmem>>, vector<4x8xf32>
    %c0_121 = arith.constant 0 : index
    %c112 = arith.constant 112 : index
    %91 = vector.load %arg13[%c0_121, %c112] : memref<4x136xf32, #tpu.memory_space<vmem>>, vector<4x8xf32>
    tpu.vector_store %arg13[%c0_121, %c112], %90 {strides = array<i32>} : memref<4x136xf32, #tpu.memory_space<vmem>>, vector<4x8xf32>,
    %c15_122 = arith.constant 15 : index
    %c0_123 = arith.constant 0 : index
    %92 = tpu.strided_load %arg12[%c15_122, %c0_123] {strides = array<i32: 4, 1>} : memref<30x8xf32, #tpu.memory_space<vmem>>, vector<4x8xf32>
    %c0_124 = arith.constant 0 : index
    %c120 = arith.constant 120 : index
    %93 = vector.load %arg13[%c0_124, %c120] : memref<4x136xf32, #tpu.memory_space<vmem>>, vector<4x8xf32>
    tpu.vector_store %arg13[%c0_124, %c120], %92 {strides = array<i32>} : memref<4x136xf32, #tpu.memory_space<vmem>>, vector<4x8xf32>,
    %c16_125 = arith.constant 16 : index
    %c0_126 = arith.constant 0 : index
    %94 = tpu.strided_load %arg12[%c16_125, %c0_126] {strides = array<i32: 4, 1>} : memref<30x8xf32, #tpu.memory_space<vmem>>, vector<4x8xf32>
    %c0_127 = arith.constant 0 : index
    %c128 = arith.constant 128 : index
    %95 = vector.load %arg13[%c0_127, %c128] : memref<4x136xf32, #tpu.memory_space<vmem>>, vector<4x8xf32>
    tpu.vector_store %arg13[%c0_127, %c128], %94 {strides = array<i32>} : memref<4x136xf32, #tpu.memory_space<vmem>>, vector<4x8xf32>,
    %c0_128 = arith.constant 0 : index
    %c0_129 = arith.constant 0 : index
    %96 = vector.load %arg13[%c0_128, %c0_129] : memref<4x136xf32, #tpu.memory_space<vmem>>, vector<4x136xf32>
    %c0_130 = arith.constant 0 : index
    %c0_131 = arith.constant 0 : index
    %97 = vector.load %arg5[%c0_130, %c0_131] : memref<136x8xf32, #tpu.memory_space<vmem>>, vector<136x8xf32>
    %cst_132 = arith.constant dense<0.000000e+00> : vector<4x8xf32>
    %98 = tpu.matmul %96, %97, %cst_132 {dimension_numbers = #tpu.dot_dimension_numbers<[1], [0], [0], [1], [0, 0, 1, 1], [], []>} : vector<4x136xf32>, vector<136x8xf32>, vector<4x8xf32> -> vector<4x8xf32>
    %c0_133 = arith.constant 0 : index
    %c0_134 = arith.constant 0 : index
    %c0_135 = arith.constant 0 : index
    %99 = vector.load %arg2[%c0_133, %c0_134, %c0_135] : memref<1x4x4xf32, #tpu.memory_space<vmem>>, vector<1x4x4xf32>
    %100 = vector.shape_cast %99 : vector<1x4x4xf32> to vector<4x4xf32>
    %c0_136 = arith.constant 0 : index
    %c0_137 = arith.constant 0 : index
    %101 = vector.load %arg6[%c0_136, %c0_137] : memref<4x8xf32, #tpu.memory_space<vmem>>, vector<4x8xf32>
    %cst_138 = arith.constant dense<0.000000e+00> : vector<4x8xf32>
    %102 = tpu.matmul %100, %101, %cst_138 {dimension_numbers = #tpu.dot_dimension_numbers<[1], [0], [0], [1], [0, 0, 1, 1], [], []>} : vector<4x4xf32>, vector<4x8xf32>, vector<4x8xf32> -> vector<4x8xf32>
    %103 = arith.addf %98, %102 : vector<4x8xf32>
    %c0_139 = arith.constant 0 : index
    %c0_140 = arith.constant 0 : index
    %104 = vector.load %arg7[%c0_139, %c0_140] : memref<1x8xf32, #tpu.memory_space<vmem>>, vector<1x8xf32>
    %105 = vector.broadcast %104 : vector<1x8xf32> to vector<4x8xf32>
    %106 = arith.subf %103, %105 : vector<4x8xf32>
    %c0_141 = arith.constant 0 : index
    %c0_142 = arith.constant 0 : index
    %107 = vector.load %arg8[%c0_141, %c0_142] : memref<1x8xf32, #tpu.memory_space<vmem>>, vector<1x8xf32>
    %108 = vector.broadcast %107 : vector<1x8xf32> to vector<4x8xf32>
    %109 = arith.mulf %106, %108 : vector<4x8xf32>
    %cst_143 = arith.constant 0.000000e+00 : f32
    %110 = vector.broadcast %cst_143 : f32 to vector<4x8xf32>
    %111 = arith.maximumf %109, %110 : vector<4x8xf32>
    %c0_144 = arith.constant 0 : index
    %c0_145 = arith.constant 0 : index
    %c0_146 = arith.constant 0 : index
    %112 = vector.load %arg9[%c0_144, %c0_145, %c0_146] : memref<1x4x8xf32, #tpu.memory_space<vmem>>, vector<1x4x8xf32>
    %113 = vector.shape_cast %112 : vector<1x4x8xf32> to vector<4x8xf32>
    %114 = vector.shape_cast %111 : vector<4x8xf32> to vector<1x4x8xf32>
    tpu.vector_store %arg9[%c0_144, %c0_145, %c0_146], %114 {strides = array<i32>} : memref<1x4x8xf32, #tpu.memory_space<vmem>>, vector<1x4x8xf32>,
    %c0_147 = arith.constant 0 : index
    %c0_148 = arith.constant 0 : index
    %c0_149 = arith.constant 0 : index
    %115 = vector.load %arg10[%c0_147, %c0_148, %c0_149] : memref<1x4x8xf32, #tpu.memory_space<vmem>>, vector<1x4x8xf32>
    %116 = vector.shape_cast %115 : vector<1x4x8xf32> to vector<4x8xf32>
    %117 = vector.shape_cast %103 : vector<4x8xf32> to vector<1x4x8xf32>
    tpu.vector_store %arg10[%c0_147, %c0_148, %c0_149], %117 {strides = array<i32>} : memref<1x4x8xf32, #tpu.memory_space<vmem>>, vector<1x4x8xf32>,
    return
  }
  func.func @transform_0(%arg0: i32) -> (i32, i32, i32) {
    %c0_i32 = arith.constant 0 : i32
    %c0_i32_0 = arith.constant 0 : i32
    %c0_i32_1 = arith.constant 0 : i32
    return %arg0, %c0_i32, %c0_i32_0 : i32, i32, i32
  }
  func.func @transform_1(%arg0: i32) -> (i32, i32, i32) {
    %c0_i32 = arith.constant 0 : i32
    %c0_i32_0 = arith.constant 0 : i32
    %c0_i32_1 = arith.constant 0 : i32
    return %arg0, %c0_i32, %c0_i32_0 : i32, i32, i32
  }
  func.func @transform_2(%arg0: i32) -> (i32, i32) {
    %c0_i32 = arith.constant 0 : i32
    %c0_i32_0 = arith.constant 0 : i32
    %c0_i32_1 = arith.constant 0 : i32
    return %c0_i32, %c0_i32_0 : i32, i32
  }
  func.func @transform_3(%arg0: i32) -> (i32, i32) {
    %c0_i32 = arith.constant 0 : i32
    %c0_i32_0 = arith.constant 0 : i32
    %c0_i32_1 = arith.constant 0 : i32
    return %c0_i32, %c0_i32_0 : i32, i32
  }
  func.func @transform_4(%arg0: i32) -> (i32, i32) {
    %c0_i32 = arith.constant 0 : i32
    %c0_i32_0 = arith.constant 0 : i32
    %c0_i32_1 = arith.constant 0 : i32
    return %c0_i32, %c0_i32_0 : i32, i32
  }
  func.func @transform_5(%arg0: i32) -> (i32, i32) {
    %c0_i32 = arith.constant 0 : i32
    %c0_i32_0 = arith.constant 0 : i32
    %c0_i32_1 = arith.constant 0 : i32
    return %c0_i32, %c0_i32_0 : i32, i32
  }
  func.func @transform_6(%arg0: i32) -> (i32, i32) {
    %c0_i32 = arith.constant 0 : i32
    %c0_i32_0 = arith.constant 0 : i32
    %c0_i32_1 = arith.constant 0 : i32
    return %c0_i32, %c0_i32_0 : i32, i32
  }
  func.func @transform_7(%arg0: i32) -> (i32, i32) {
    %c0_i32 = arith.constant 0 : i32
    %c0_i32_0 = arith.constant 0 : i32
    %c0_i32_1 = arith.constant 0 : i32
    return %c0_i32, %c0_i32_0 : i32, i32
  }
  func.func @transform_8(%arg0: i32) -> (i32, i32, i32) {
    %c0_i32 = arith.constant 0 : i32
    %c0_i32_0 = arith.constant 0 : i32
    %c0_i32_1 = arith.constant 0 : i32
    return %arg0, %c0_i32, %c0_i32_0 : i32, i32, i32
  }
  func.func @transform_9(%arg0: i32) -> (i32, i32, i32) {
    %c0_i32 = arith.constant 0 : i32
    %c0_i32_0 = arith.constant 0 : i32
    %c0_i32_1 = arith.constant 0 : i32
    return %arg0, %c0_i32, %c0_i32_0 : i32, i32, i32
  }
}

</mosaic_0001>

<bundles_post_ra>
// kernel: tpu_custom_call.1
= control target key start
LH: loop header
LB: loop body
LE: loop exit
PB: predicated region body
PF: predicated region fallthrough
CT: control target
= control target key end

     0   :  { %s1808_s0 = inlined_call_operand.vmem [shape: f32[2,32,4], index: 0, kind: input, shape index: {}]   ;;  %s1809_s1 = inlined_call_operand.vmem [shape: f32[2,4,4], index: 1, kind: input, shape index: {}]   ;;  %s1810_s2 = inlined_call_operand.vmem [shape: f32[68,8], index: 2, kind: input, shape index: {}]   ;;  %s1811_s3 = inlined_call_operand.vmem [shape: f32[1,8], index: 3, kind: input, shape index: {}]   ;;  %s1812_s4 = inlined_call_operand.vmem [shape: f32[136,8], index: 4, kind: input, shape index: {}]   ;;  %s1813_s5 = inlined_call_operand.vmem [shape: f32[4,8], index: 5, kind: input, shape index: {}]   ;;  %s1814_s6 = inlined_call_operand.vmem [shape: f32[1,8], index: 6, kind: input, shape index: {}]   ;;  %s1815_s7 = inlined_call_operand.vmem [shape: f32[1,8], index: 7, kind: input, shape index: {}]   ;;  %s1816_s8 = inlined_call_operand.hbm [shape: f32[2,4,8], index: 8, kind: output, shape index: {0}]   ;;  %s1817_s9 = inlined_call_operand.hbm [shape: f32[2,4,8], index: 9, kind: output, shape index: {1}]  }
   0x1   :  { %1824 = sst [smem:[#allocation11_spill]] %s1808_s0 }
   0x2   :  { %15 = vsyncpa [#allocation6], 0 }
   0x3   :  { %17 = vsyncpa [#allocation6 + $0x1], 0 }
   0x4   :  { %18 = vsyncpa [#allocation8], 0 }
   0x5   :  { %20 = vsyncpa [#allocation8 + $0x1], 0  ;;  %s1486_s30 = smov 0   ;;  %s1488_s10 = smov 0  }
   0x6   :  { %s1490_s11 = smov 0   ;;  %s1492_s12 = smov 0  }
   0x7 LB: > { %s1507_s13 = sadd.s32 4294967295, %s1406_s12   ;;  %s1136_s14 = sadd.s32 4294967294, %s1406_s12   ;;  %s1406_s12 = sphi %s1492_s12, %s1838_s12   ;;  %s1402_s11 = sphi %s1490_s11, %s1837_s11   ;;  %s1398_s10 = sphi %s1488_s10, %s1836_s10   ;;  %s1394_s30 = sphi %s1486_s30, %s1835_s30  }
   0x8   : > { %s1511_s15 = sadd.s32 1, %s1406_s12   ;;  %s211_s16 = sadd.s32 1, %s1402_s11 }
   0x9   : > { %s208_s17 = ssub.s32 %s1406_s12, %s1511_s15  ;;  %p221_p0 = scmp.ne.s32.totalorder %s1402_s11, %s1398_s10 }
   0xa   : > { %p209_p1 = scmp.eq.s32.totalorder %s208_s17, 0  ;;  %p222_p2 = scmp.eq.s32.totalorder %s1507_s13, 1 }
   0xb   : > { %p227_p3 = scmp.ne.s32.totalorder %s1398_s10, %s1394_s30  ;;  %p228_p4 = scmp.eq.s32.totalorder %s1136_s14, 1 }
   0xc   : > { %s1522_s18 = scalar_select %p209_p1, %s1402_s11, %s211_s16  }
   0xd   : > { %p1524_p5 = por %p222_p2, %p221_p0  ;;  %p1528_p6 = por %p228_p4, %p227_p3 }
   0xe   : > { %p1139_p7 = scmp.ge.s32.totalorder %s1406_s12, 1  ;;  %p305_p8 = scmp.lt.s32.totalorder %s1406_s12, 3 }
  0x10   : > { %p306_p9 = pnand %p1139_p7, %p305_p8 }
  0x11   : > { %p350_p10 = scmp.lt.s32.totalorder (!%p306_p9), %s1507_s13, 1  ;;  %s1827_s0 = sld [smem:[#allocation11_spill]] (!%p306_p9)  ;;  %vm361_vm0 = vcmask (!%p306_p9), 31744   ;;  %v574_v19 = vld [vmem:[%s1810_s2] sm:$0xff] (!%p306_p9)  ;;  %v575_v20 = vld [vmem:[%s1810_s2 + $0x8] sm:$0xff] (!%p306_p9)  ;;  %v576_v23 = vld [vmem:[%s1810_s2 + $0x10] sm:$0xff] (!%p306_p9) }
  0x12   : > { %309 = sbr.rel (%p306_p9) target bundleno = 845 (0x34d), region = 52  ;;  %s1408_s26 = smov (!%p306_p9), 4   ;;  %v1200_v21 = vpack.c.bf16 (!%p306_p9), %v575_v20, %v574_v19  ;;  %v577_v24 = vld [vmem:[%s1810_s2 + $0x18] sm:$0xff] (!%p306_p9)  ;;  %v578_v27 = vld [vmem:[%s1810_s2 + $0x20] sm:$0xff] (!%p306_p9)  ;;  %v579_v28 = vld [vmem:[%s1810_s2 + $0x28] sm:$0xff] (!%p306_p9)  ;;  %vm597_vm1 = vcmask (!%p306_p9), 1043456  }
  0x13   : > { %s1409_s27 = smov (!%p306_p9), 8   ;;  %s1410_s28 = smov (!%p306_p9), 12   ;;  %v1204_v25 = vpack.c.bf16 (!%p306_p9), %v577_v24, %v576_v23  ;;  %v1208_v29 = vpack.c.bf16 (!%p306_p9), %v579_v28, %v578_v27  ;;  %v580_v31 = vld [vmem:[%s1810_s2 + $0x30] sm:$0xff] (!%p306_p9)  ;;  %v581_v32 = vld [vmem:[%s1810_s2 + $0x38] sm:$0xff] (!%p306_p9)  ;;  %v582_v35 = vld [vmem:[%s1810_s2 + $0x40] sm:$0xf] (!%p306_p9) }
  0x14   : > { %s1411_s29 = smov (!%p306_p9), 16   ;;  %s1412_s14 = smov (!%p306_p9), 20   ;;  %1201 = vmatprep.subr.bf16.mxu0 (!%p306_p9), %v1200_v21  ;;  %v1212_v33 = vpack.c.bf16 (!%p306_p9), %v581_v32, %v580_v31  ;;  %vm374_vm2 = vcmask (!%p306_p9), 64544   ;;  %vm387_vm3 = vcmask (!%p306_p9), 97344   ;;  %vm400_vm4 = vcmask (!%p306_p9), 130144   ;;  %v815_v20 = vld [vmem:[%s1812_s4 + $0x10] sm:$0xff] (!%p306_p9) }
  0x15   : > { %s1818_s16 = smov (!%p306_p9), 24   ;;  %s1414_s17 = smov (!%p306_p9), 28   ;;  %1203 = vmatpush3.bf16.msra.mxu0 (!%p306_p9), %v1200_v21  ;;  %vm413_vm5 = vcmask (!%p306_p9), 162944   ;;  %vm426_vm6 = vcmask (!%p306_p9), 195744   ;;  %vm439_vm7 = vcmask (!%p306_p9), 228544   ;;  %vm452_vm8 = vcmask (!%p306_p9), 261344  }
  0x16   : > { %s1416_s23 = smov (!%p306_p9), 36   ;;  %1205 = vmatprep.subr.bf16.mxu0 (!%p306_p9), %v1204_v25  ;;  %s1422_s24 = smov (!%p306_p9), 60   ;;  %vm465_vm9 = vcmask (!%p306_p9), 294144   ;;  %vm478_vm10 = vcmask (!%p306_p9), 326944   ;;  %vm491_vm11 = vcmask (!%p306_p9), 359744   ;;  %vm504_vm12 = vcmask (!%p306_p9), 392544  }
  0x17   : > { %vm517_vm13 = vcmask (!%p306_p9), 425344   ;;  %vm530_vm14 = vcmask (!%p306_p9), 458144   ;;  %vm543_vm15 = vcmask (!%p306_p9), 490944   ;;  %v816_v21 = vld [vmem:[%s1812_s4 + $0x18] sm:$0xff] (!%p306_p9)  ;;  %v817_v31 = vld [vmem:[%s1812_s4 + $0x20] sm:$0xff] (!%p306_p9)  ;;  %v818_v32 = vld [vmem:[%s1812_s4 + $0x28] sm:$0xff] (!%p306_p9) }
  0x19   : > { %s1536_s21 = scalar_select %p350_p10, %s1507_s13, 1  ;;  %1207 = vmatpush3.bf16.msra.mxu0 %v1204_v25 }
  0x1a   : > { %1209 = vmatprep.subr.bf16.mxu0 %v1208_v29 }
  0x1b   : > { %s1160_s22 = sshll.u32 %s1536_s21, 5 }
  0x1c   : > { %s1542_s25 = scalar_lea.vmem %s1827_s0, %s1160_s22  ;;  %s1820_s22 = smov 32  }
  0x1d   : > { %v364_v0 = vld [vmem:[%s1542_s25 + $0x1] sm:$0xff]  ;;  %v365_v2 = vld [vmem:[%s1542_s25 + $0x9] sm:$0xff]  ;;  %v469_v17 = vld [vmem:[%s1542_s25 + $0x11] sm:$0xff]  ;;  %1211 = vmatpush3.bf16.msra.mxu0 %v1208_v29 }
  0x1e   : > { %v377_v1 = vld [vmem:[%s1542_s25 + $0x2] sm:$0xff]  ;;  %368 = vrot.lane.b32.xlu0 %v364_v0, %s1408_s26  ;;  %v378_v3 = vld [vmem:[%s1542_s25 + $0xa] sm:$0xff]  ;;  %v482_v18 = vld [vmem:[%s1542_s25 + $0x12] sm:$0xff]  ;;  %1213 = vmatprep.subr.bf16.mxu0 %v1212_v33 }
  0x1f   : > { %381 = vrot.lane.b32.xlu1 %v377_v1, %s1409_s27  ;;  %v455_v4 = vld [vmem:[%s1542_s25 + $0x8] sm:$0xff]  ;;  %v359_v7 = vld [vmem:[%s1542_s25] sm:$0xff]  ;;  %v456_v16 = vld [vmem:[%s1542_s25 + $0x10] sm:$0xff] }
  0x20   : > { %v390_v5 = vld [vmem:[%s1542_s25 + $0x3] sm:$0xff]  ;;  %v391_v6 = vld [vmem:[%s1542_s25 + $0xb] sm:$0xff]  ;;  %363 = vst.msk [vmem:[#allocation2 + $0x8] sm:$0xff] %vm361_vm0, %v455_v4  ;;  %362 = vst.msk [vmem:[#allocation2] sm:$0xff] %vm361_vm0, %v359_v7 }
  0x21   : > { %v403_v8 = vld [vmem:[%s1542_s25 + $0x4] sm:$0xff]  ;;  %v404_v9 = vld [vmem:[%s1542_s25 + $0xc] sm:$0xff]  ;;  %v508_v26 = vld [vmem:[%s1542_s25 + $0x14] sm:$0xff]  ;;  %1215 = vmatpush3.bf16.msra.mxu0 %v1212_v33 }
  0x22   : > { %370 = vrot.lane.b32.xlu0 %v365_v2, %s1408_s26  ;;  %v416_v10 = vld [vmem:[%s1542_s25 + $0x5] sm:$0xff]  ;;  %v417_v11 = vld [vmem:[%s1542_s25 + $0xd] sm:$0xff]  ;;  %v521_v30 = vld [vmem:[%s1542_s25 + $0x15] sm:$0xff]  ;;  %1190 = vmatprep.subr.msk.mxu0 %vm597_vm1, %v582_v35  ;;  %s1423_s26 = smov 64  }
  0x23   : > { %383 = vrot.lane.b32.xlu1 %v378_v3, %s1409_s27  ;;  %v429_v12 = vld [vmem:[%s1542_s25 + $0x6] sm:$0xff]  ;;  %v430_v13 = vld [vmem:[%s1542_s25 + $0xe] sm:$0xff]  ;;  %v534_v34 = vld [vmem:[%s1542_s25 + $0x16] sm:$0xff] }
  0x24   : > { %v442_v14 = vld [vmem:[%s1542_s25 + $0x7] sm:$0xff]  ;;  %v443_v15 = vld [vmem:[%s1542_s25 + $0xf] sm:$0xff]  ;;  %v547_v36 = vld [vmem:[%s1542_s25 + $0x17] sm:$0xff] }
  0x25   : > { %v495_v22 = vld [vmem:[%s1542_s25 + $0x13] sm:$0xff]  ;;  %1191 = vmatpush3.msk.msra.mxu0 %vm597_vm1, %v582_v35  ;;  %v1223_v35 = vpack.c.bf16 %v818_v32, %v817_v31 }
  0x26   : > { %394 = vrot.lane.b32.xlu0 %v390_v5, %s1410_s28  ;;  %v560_v37 = vld [vmem:[%s1542_s25 + $0x18] sm:$0xff]  ;;  %v819_v33 = vld [vmem:[%s1812_s4 + $0x30] sm:$0xff]  ;;  %s1431_s25 = smov 112  }
  0x27   : > { %396 = vrot.lane.b32.xlu1 %v391_v6, %s1410_s28  ;;  %s1418_s28 = smov 44  }
  0x2a   : > { %407 = vrot.lane.b32.xlu0 %v403_v8, %s1411_s29  ;;  %v1424_v8 = vmov 0.0  }
  0x2b   : > { %409 = vrot.lane.b32.xlu1 %v404_v9, %s1411_s29  ;;  %1195 = vmatprep.subr.mxu0 %v1424_v8 }
  0x2e   : > { %420 = vrot.lane.b32.xlu0 %v416_v10, %s1412_s14 }
  0x2f   : > { %422 = vrot.lane.b32.xlu1 %v417_v11, %s1412_s14  ;;  %s1829_s14 = smov 24  }
  0x32   : > { %433 = vrot.lane.b32.xlu0 %v429_v12, %s1818_s16 }
  0x33   : > { %435 = vrot.lane.b32.xlu1 %v430_v13, %s1818_s16  ;;  %s1426_s16 = smov 80  }
  0x36   : > { %446 = vrot.lane.b32.xlu0 %v442_v14, %s1414_s17 }
  0x37   : > { %448 = vrot.lane.b32.xlu1 %v443_v15, %s1414_s17  ;;  %s1819_s17 = smov 40  }
  0x3a   : > { %459 = vrot.lane.b32.xlu0 %v455_v4, %s1820_s22 }
  0x3b   : > { %461 = vrot.lane.b32.xlu1 %v456_v16, %s1820_s22  ;;  %s1420_s22 = smov 52  }
  0x3e   : > { %472 = vrot.lane.b32.xlu0 %v365_v2, %s1416_s23 }
  0x3f   : > { %474 = vrot.lane.b32.xlu1 %v469_v17, %s1416_s23  ;;  %s1821_s23 = smov 48   ;;  %v814_v17 = vld [vmem:[%s1812_s4 + $0x8] sm:$0xff] }
  0x42   : > { %485 = vrot.lane.b32.xlu0 %v378_v3, %s1819_s17 }
  0x43   : > { %487 = vrot.lane.b32.xlu1 %v482_v18, %s1819_s17  ;;  %v1425_v18 = vmov 0.0|0.0   ;;  %s1432_s17 = smov 104  }
  0x44   : > { %1216 = vmatprep.subr.bf16.mxu1 %v1425_v18 }
  0x46   : > { %498 = vrot.lane.b32.xlu0 %v391_v6, %s1418_s28 }
  0x47   : > { %500 = vrot.lane.b32.xlu1 %v495_v22, %s1418_s28  ;;  %v1220_v22 = vpack.c.bf16 %v816_v21, %v815_v20  ;;  %v1153_v20 = vld [vmem:[%s1815_s7] ss:$0 sm:$0xff] }
  0x4a   : > { %511 = vrot.lane.b32.xlu0 %v404_v9, %s1821_s23  ;;  %v1145_v9 = vld [vmem:[%s1811_s3] ss:$0 sm:$0xff] }
  0x4b   : > { %513 = vrot.lane.b32.xlu1 %v508_v26, %s1821_s23  ;;  %s1822_s23 = smov 56  }
  0x4e   : > { %524 = vrot.lane.b32.xlu0 %v417_v11, %s1420_s22 }
  0x4f   : > { %526 = vrot.lane.b32.xlu1 %v521_v30, %s1420_s22  ;;  %s1828_s22 = smov 32  }
  0x52   : > { %537 = vrot.lane.b32.xlu0 %v430_v13, %s1822_s23 }
  0x53   : > { %539 = vrot.lane.b32.xlu1 %v534_v34, %s1822_s23  ;;  %v820_v34 = vld [vmem:[%s1812_s4 + $0x38] sm:$0xff]  ;;  %s1831_s23 = smov 40  }
  0x56   : > { %550 = vrot.lane.b32.xlu0 %v443_v15, %s1422_s24 }
  0x57   : > { %552 = vrot.lane.b32.xlu1 %v547_v36, %s1422_s24 }
  0x5a   : > { %563 = vrot.lane.b32.xlu0 %v456_v16, %s1423_s26  ;;  %v813_v16 = vld [vmem:[%s1812_s4] sm:$0xff] }
  0x5b   : > { %565 = vrot.lane.b32.xlu1 %v560_v37, %s1423_s26  ;;  %v1217_v19 = vpack.c.bf16 %v814_v17, %v813_v16  ;;  %v1226_v37 = vpack.c.bf16 %v820_v34, %v819_v33  ;;  %v1152_v17 = vld [vmem:[%s1814_s6] ss:$0 sm:$0xff] }
  0x5d   : > { %1218 = vmatpush1.bf16.msra.mxu1 %v1217_v19 }
  0x5e   : > { %1219 = vmatprep.subr.bf16.mxu1 %v1425_v18 }
  0x61   : > { %1221 = vmatpush1.bf16.msra.mxu1 %v1220_v22 }
  0x62   : > { %1222 = vmatprep.subr.bf16.mxu1 %v1425_v18 }
  0x65   : > { %1224 = vmatpush1.bf16.msra.mxu1 %v1223_v35 }
  0x66   : > { %1225 = vmatprep.subr.bf16.mxu1 %v1425_v18 }
  0x69   : > { %1227 = vmatpush1.bf16.msra.mxu1 %v1226_v37 }
  0x6a   : > { %1228 = vmatprep.subr.bf16.mxu1 %v1425_v18 }
  0x90   : > { %v369_v38 = vpop.permute.xlu0 %368 }
  0x91   : > { %v382_v39 = vpop.permute.xlu1 %381  ;;  %375 = vst.msk [vmem:[#allocation2] sm:$0xff] %vm374_vm2, %v369_v38 }
  0x92   : > { %388 = vst.msk [vmem:[#allocation2] sm:$0xff] %vm387_vm3, %v382_v39  ;;  %v821_v39 = vld [vmem:[%s1812_s4 + $0x40] sm:$0xff] }
  0x94   : > { %v371_v40 = vpop.permute.xlu0 %370 }
  0x95   : > { %v384_v41 = vpop.permute.xlu1 %383  ;;  %376 = vst.msk [vmem:[#allocation2 + $0x8] sm:$0xff] %vm374_vm2, %v371_v40  ;;  %vm556_vm2 = vcmask 523744   ;;  %v822_v40 = vld [vmem:[%s1812_s4 + $0x48] sm:$0xff] }
  0x96   : > { %389 = vst.msk [vmem:[#allocation2 + $0x8] sm:$0xff] %vm387_vm3, %v384_v41  ;;  %vm569_vm3 = vcmask 556544  }
  0x98   : > { %v395_v42 = vpop.permute.xlu0 %394 }
  0x99   : > { %v397_v43 = vpop.permute.xlu1 %396  ;;  %401 = vst.msk [vmem:[#allocation2] sm:$0xff] %vm400_vm4, %v395_v42 }
  0x9a   : > { %402 = vst.msk [vmem:[#allocation2 + $0x8] sm:$0xff] %vm400_vm4, %v397_v43  ;;  %vm590_vm4 = vcmask 556032   ;;  %v1229_v43 = vpack.c.bf16 %v822_v40, %v821_v39 }
  0x9c   : > { %v408_v44 = vpop.permute.xlu0 %407  ;;  %1230 = vmatpush1.bf16.msra.mxu1 %v1229_v43 }
  0x9d   : > { %v410_v45 = vpop.permute.xlu1 %409  ;;  %414 = vst.msk [vmem:[#allocation2] sm:$0xff] %vm413_vm5, %v408_v44  ;;  %v823_v44 = vld [vmem:[%s1812_s4 + $0x50] sm:$0xff]  ;;  %1231 = vmatprep.subr.bf16.mxu1 %v1425_v18 }
  0x9e   : > { %415 = vst.msk [vmem:[#allocation2 + $0x8] sm:$0xff] %vm413_vm5, %v410_v45  ;;  %vm678_vm5 = vcmask 64512   ;;  %v824_v45 = vld [vmem:[%s1812_s4 + $0x58] sm:$0xff] }
  0x9f   : > { %680 = vst.msk [vmem:[#allocation3 + $0x8] sm:$0xff] %vm678_vm5, %v1424_v8  ;;  %681 = vst.msk [vmem:[#allocation3 + $0x10] sm:$0xff] %vm678_vm5, %v1424_v8 }
  0xa0   : > { %v421_v46 = vpop.permute.xlu0 %420  ;;  %679 = vst.msk [vmem:[#allocation3] sm:$0xff] %vm678_vm5, %v1424_v8 }
  0xa1   : > { %v423_v47 = vpop.permute.xlu1 %422  ;;  %427 = vst.msk [vmem:[#allocation2] sm:$0xff] %vm426_vm6, %v421_v46  ;;  %v831_v46 = vld [vmem:[%s1813_s5] sm:$0xf] }
  0xa2   : > { %428 = vst.msk [vmem:[#allocation2 + $0x8] sm:$0xff] %vm426_vm6, %v423_v47  ;;  %vm682_vm6 = vcmask 62464  }
  0xa3   : > { %683 = vst.msk [vmem:[#allocation3 + $0x18] sm:$0x3f] %vm682_vm6, %v1424_v8  ;;  %vm791_vm6 = vcmask 913216  }
  0xa4   : > { %v434_v48 = vpop.permute.xlu0 %433 }
  0xa5   : > { %v436_v49 = vpop.permute.xlu1 %435  ;;  %440 = vst.msk [vmem:[#allocation2] sm:$0xff] %vm439_vm7, %v434_v48 }
  0xa6   : > { %441 = vst.msk [vmem:[#allocation2 + $0x8] sm:$0xff] %vm439_vm7, %v436_v49  ;;  %vm687_vm7 = vcmask 60416   ;;  %v1232_v49 = vpack.c.bf16 %v824_v45, %v823_v44 }
  0xa8   : > { %v447_v50 = vpop.permute.xlu0 %446  ;;  %1233 = vmatpush1.bf16.msra.mxu1 %v1232_v49 }
  0xa9   : > { %v449_v51 = vpop.permute.xlu1 %448  ;;  %453 = vst.msk [vmem:[#allocation2] sm:$0xff] %vm452_vm8, %v447_v50  ;;  %1234 = vmatprep.subr.bf16.mxu1 %v1425_v18 }
  0xaa   : > { %454 = vst.msk [vmem:[#allocation2 + $0x8] sm:$0xff] %vm452_vm8, %v449_v51  ;;  %vm1428_vm8 = vmmov 0   ;;  %v825_v51 = vld [vmem:[%s1812_s4 + $0x60] sm:$0xff] }
  0xac   : > { %v460_v52 = vpop.permute.xlu0 %459 }
  0xad   : > { %v462_v53 = vpop.permute.xlu1 %461  ;;  %466 = vst.msk [vmem:[#allocation2] sm:$0xff] %vm465_vm9, %v460_v52  ;;  %v826_v52 = vld [vmem:[%s1812_s4 + $0x68] sm:$0xff] }
  0xae   : > { %467 = vst.msk [vmem:[#allocation2 + $0x8] sm:$0xff] %vm465_vm9, %v462_v53  ;;  %vm711_vm9 = vcmask 257216  }
  0xb0   : > { %v473_v54 = vpop.permute.xlu0 %472 }
  0xb1   : > { %v475_v55 = vpop.permute.xlu1 %474  ;;  %479 = vst.msk [vmem:[#allocation2] sm:$0xff] %vm478_vm10, %v473_v54  ;;  %v1235_v54 = vpack.c.bf16 %v826_v52, %v825_v51 }
  0xb2   : > { %480 = vst.msk [vmem:[#allocation2 + $0x8] sm:$0xff] %vm478_vm10, %v475_v55  ;;  %vm719_vm10 = vcmask 322816  }
  0xb3   : > { %1236 = vmatpush1.bf16.msra.mxu1 %v1235_v54 }
  0xb4   : > { %v486_v56 = vpop.permute.xlu0 %485  ;;  %1237 = vmatprep.subr.bf16.mxu1 %v1425_v18 }
  0xb5   : > { %v488_v57 = vpop.permute.xlu1 %487  ;;  %492 = vst.msk [vmem:[#allocation2] sm:$0xff] %vm491_vm11, %v486_v56  ;;  %v827_v56 = vld [vmem:[%s1812_s4 + $0x70] sm:$0xff] }
  0xb6   : > { %493 = vst.msk [vmem:[#allocation2 + $0x8] sm:$0xff] %vm491_vm11, %v488_v57  ;;  %v828_v57 = vld [vmem:[%s1812_s4 + $0x78] sm:$0xff]  ;;  %vm727_vm11 = vcmask 388416  }
  0xb8   : > { %v499_v58 = vpop.permute.xlu0 %498 }
  0xb9   : > { %v501_v59 = vpop.permute.xlu1 %500  ;;  %505 = vst.msk [vmem:[#allocation2] sm:$0xff] %vm504_vm12, %v499_v58  ;;  %v1238_v58 = vpack.c.bf16 %v828_v57, %v827_v56 }
  0xba   : > { %506 = vst.msk [vmem:[#allocation2 + $0x8] sm:$0xff] %vm504_vm12, %v501_v59  ;;  %vm735_vm12 = vcmask 454016  }
  0xbb   : > { %1239 = vmatpush1.bf16.msra.mxu1 %v1238_v58 }
  0xbc   : > { %v512_v60 = vpop.permute.xlu0 %511  ;;  %944 = vmatprep.subr.mxu1 %v1424_v8 }
  0xbd   : > { %v514_v61 = vpop.permute.xlu1 %513  ;;  %518 = vst.msk [vmem:[#allocation2] sm:$0xff] %vm517_vm13, %v512_v60  ;;  %v829_v60 = vld [vmem:[%s1812_s4 + $0x80] sm:$0xff] }
  0xbe   : > { %519 = vst.msk [vmem:[#allocation2 + $0x8] sm:$0xff] %vm517_vm13, %v514_v61  ;;  %vm743_vm13 = vcmask 519616  }
  0xbf   : > { %945 = vmatpush1.msra.mxu1 %v829_v60 }
  0xc0   : > { %v525_v62 = vpop.permute.xlu0 %524 }
  0xc1   : > { %v527_v63 = vpop.permute.xlu1 %526  ;;  %531 = vst.msk [vmem:[#allocation2] sm:$0xff] %vm530_vm14, %v525_v62 }
  0xc2   : > { %532 = vst.msk [vmem:[#allocation2 + $0x8] sm:$0xff] %vm530_vm14, %v527_v63  ;;  %vm751_vm14 = vcmask 585216  }
  0xc4   : > { %v538_v0 = vpop.permute.xlu0 %537 }
  0xc5   : > { %v540_v1 = vpop.permute.xlu1 %539  ;;  %544 = vst.msk [vmem:[#allocation2] sm:$0xff] %vm543_vm15, %v538_v0 }
  0xc6   : > { %545 = vst.msk [vmem:[#allocation2 + $0x8] sm:$0xff] %vm543_vm15, %v540_v1  ;;  %vm759_vm15 = vcmask 650816  }
  0xc8   : > { %v551_v2 = vpop.permute.xlu0 %550 }
  0xc9   : > { %v553_v3 = vpop.permute.xlu1 %552  ;;  %557 = vst.msk [vmem:[#allocation2] sm:$0xff] %vm556_vm2, %v551_v2 }
  0xca   : > { %558 = vst.msk [vmem:[#allocation2 + $0x8] sm:$0xff] %vm556_vm2, %v553_v3  ;;  %vm767_vm2 = vcmask 716416  }
  0xcc   : > { %v564_v4 = vpop.permute.xlu0 %563 }
  0xcd   : > { %v566_v5 = vpop.permute.xlu1 %565  ;;  %570 = vst.msk [vmem:[#allocation2] sm:$0xff] %vm569_vm3, %v564_v4 }
  0xce   : > { %571 = vst.msk [vmem:[#allocation2 + $0x8] sm:$0xff] %vm569_vm3, %v566_v5  ;;  %vm775_vm3 = vcmask 782016  }
  0xd4   : > { %v572_v6 = vld [vmem:[#allocation2] sm:$0xff] }
  0xd5   : > { %v573_v7 = vld [vmem:[#allocation2 + $0x8] sm:$0xff]  ;;  %1192 = vmatprep.mubr.msk.f32.mxu0 %vm590_vm4, %v572_v6 }
  0xd6   : > { %1193 = vmatmul.mubr.msk.f32.vlgmr.msra.gmra.mrb[0].mxu0 %vm590_vm4, %v573_v7  ;;  %vm783_vm4 = vcmask 847616  }
  0xd7   : > { %1196 = vmatpush3.msk.msra.mxu0 %vm597_vm1, %v831_v46  ;;  %1197 = vmatprep.mubr.msk.f32.mxu0 %vm1428_vm8, %v1424_v8  ;;  %vm703_vm1 = vcmask 191616   ;;  %vm799_vm8 = vcmask 978816  }
 0x1a9   : > { %v1194_v10 = vpop.f32.mrb[0].mxu0 }
 0x1aa   : > { %v673_v11 = vadd.f32 %v1194_v10, %v1145_v9  ;;  %v667_v12 = vpop.f32.mrb[1].mxu0 }
 0x1ab   : > { %v668_v13 = vadd.f32 %v1145_v9, %v667_v12 }
 0x1ac   : > { %v677_v14 = vmax.f32 %v673_v11, 0.0 }
 0x1ad   : > { %v676_v15 = vmax.f32 %v668_v13, 0.0 }
 0x1ae   : > { %685 = vst.msk [vmem:[#allocation3 + $0xf] sm:$0xff] %vm678_vm5, %v677_v14 }
 0x1af   : > { %684 = vst.msk [vmem:[#allocation3 + $0x7] sm:$0xff] %vm678_vm5, %v676_v15 }
 0x1b5   : > { %v810_v23 = vld [vmem:[#allocation3 + $0x10] ss:$4 sm:$0xf]  ;;  %v802_v59 = vld [vmem:[#allocation3 + $0xf] ss:$4 sm:$0xf] }
 0x1b6   : > { %v698_v24 = vld [vmem:[#allocation3 + $0x2] ss:$4 sm:$0xf]  ;;  %v690_v25 = vld [vmem:[#allocation3 + $0x1] ss:$4 sm:$0xf] }
 0x1b7   : > { %811 = vst.msk [vmem:[#allocation4 + $0x4] sm:$0xf] %vm687_vm7, %v810_v23  ;;  %700 = vrot.lane.b32.xlu1 %v698_v24, %s1411_s29  ;;  %692 = vrot.lane.b32.xlu0 %v690_v25, %s1409_s27  ;;  %v714_v26 = vld [vmem:[#allocation3 + $0x4] ss:$4 sm:$0xf]  ;;  %s1832_s27 = smov 56  }
 0x1b8   : > { %v706_v27 = vld [vmem:[#allocation3 + $0x3] ss:$4 sm:$0xf]  ;;  %v730_v28 = vld [vmem:[#allocation3 + $0x6] ss:$4 sm:$0xf] }
 0x1b9   : > { %v722_v29 = vld [vmem:[#allocation3 + $0x5] ss:$4 sm:$0xf]  ;;  %v686_v30 = vld [vmem:[#allocation3] ss:$4 sm:$0xf] }
 0x1ba   : > { %688 = vst.msk [vmem:[#allocation4] sm:$0xf] %vm687_vm7, %v686_v30  ;;  %v746_v36 = vld [vmem:[#allocation3 + $0x8] ss:$4 sm:$0xf]  ;;  %s1711_s29 = sand.u32 1, %s1398_s10  }
 0x1bb   : > { %716 = vrot.lane.b32.xlu1 %v714_v26, %s1828_s22  ;;  %708 = vrot.lane.b32.xlu0 %v706_v27, %s1829_s14  ;;  %s1830_s14 = smov 48   ;;  %v738_v38 = vld [vmem:[#allocation3 + $0x7] ss:$4 sm:$0xf]  ;;  %s1429_s22 = smov 96  }
 0x1bc   : > { %v762_v41 = vld [vmem:[#allocation3 + $0xa] ss:$4 sm:$0xf]  ;;  %v754_v42 = vld [vmem:[#allocation3 + $0x9] ss:$4 sm:$0xf] }
 0x1bd   : > { %v778_v48 = vld [vmem:[#allocation3 + $0xc] ss:$4 sm:$0xf]  ;;  %v770_v50 = vld [vmem:[#allocation3 + $0xb] ss:$4 sm:$0xf] }
 0x1be   : > { %v794_v53 = vld [vmem:[#allocation3 + $0xe] ss:$4 sm:$0xf]  ;;  %v786_v55 = vld [vmem:[#allocation3 + $0xd] ss:$4 sm:$0xf] }
 0x1bf   : > { %732 = vrot.lane.b32.xlu1 %v730_v28, %s1830_s14  ;;  %724 = vrot.lane.b32.xlu0 %v722_v29, %s1831_s23  ;;  %s1144_s14 = sshll.u32 %s1536_s21, 2  ;;  %s1140_s28 = sshll.u32 %s1711_s29, 2 }
 0x1c0   : > { %s358_s0 = scalar_lea.vmem %s1809_s1, %s1144_s14  ;;  %s1430_s14 = smov 88  }
 0x1c1   : > { %v830_v47 = vld [vmem:[%s358_s0] sm:$0xf]  ;;  %s1730_s23 = scalar_lea.vmem [#allocation5], %s1140_s28 }
 0x1c2   : > { %1198 = vmatmul.mubr.msk.f32.vlgmr.msra.gmra.mrb[2].mxu0 %vm361_vm0, %v830_v47  ;;  %vm695_vm0 = vcmask 126016  }
 0x1c3   : > { %748 = vrot.lane.b32.xlu1 %v746_v36, %s1423_s26  ;;  %740 = vrot.lane.b32.xlu0 %v738_v38, %s1832_s27  ;;  %s1427_s26 = smov 72   ;;  %s1433_s27 = smov 120  }
 0x1c7   : > { %764 = vrot.lane.b32.xlu1 %v762_v41, %s1426_s16  ;;  %756 = vrot.lane.b32.xlu0 %v754_v42, %s1427_s26  ;;  %s1007_s26 = scalar_lea.sflag [#allocation8], %s1711_s29 }
 0x1cb   : > { %780 = vrot.lane.b32.xlu1 %v778_v48, %s1429_s22  ;;  %772 = vrot.lane.b32.xlu0 %v770_v50, %s1430_s14  ;;  %s1823_s22 = sshll.u32 %s1507_s13, 6  ;;  %s349_s14 = scalar_lea.vmem [#allocation7], %s1140_s28 }
 0x1cc   : > { %s1033_s0 = sshll.u32 %s349_s14, 4  ;;  %s1725_s0 = int_to_ptr.vmem [resolvable:$true] %s1033_s0 }
 0x1cd   : > { %s1312_s24 = scalar_lea.vmem %s1725_s0, 64 }
 0x1ce   : > { %p1313_p11 = scmp.ne.s32.totalorder %s1725_s0, %s1312_s24 }
 0x1cf   : > { %796 = vrot.lane.b32.xlu1 %v794_v53, %s1431_s25  ;;  %788 = vrot.lane.b32.xlu0 %v786_v55, %s1432_s17  ;;  %s1723_s17 = scalar_lea.hbm %s1817_s9, %s1823_s22  ;;  %s1434_s25 = smov [#allocation7]  }
 0x1d0   : > { %p1314_p12 = pnand %p1313_p11, %p1524_p5  ;;  %s1316_s22 = sshll.u32 %s1434_s25, 4  ;;  %s1317_s22 = int_to_ptr.vmem [resolvable:$false] %s1316_s22 }
 0x1d1   : > { %p1319_p0 = scmp.lt.s32.totalorder %s1725_s0, %s1317_s22 }
 0x1d2   : > { %p1315_p13 = pneg %p1314_p12 }
 0x1d3   : > { %804 = vrot.lane.b32.xlu0 %v802_v59, %s1433_s27  ;;  %s1318_s27 = scalar_lea.vmem %s1317_s22, 128 }
 0x1d4   : > { %p1320_p1 = scmp.lt.s32.totalorder %s1318_s27, %s1312_s24 }
 0x1d6   : > { %p1321_p2 = por %p1320_p1, %p1319_p0 }
 0x1d8   : > { %p1322_p3 = pnand %p1321_p2, %p1315_p13 }
 0x229   : > { %v701_v61 = vpop.permute.xlu1 %700  ;;  %v693_v62 = vpop.permute.xlu0 %692 }
 0x22a   : > { %696 = vst.msk [vmem:[#allocation4] sm:$0xf] %vm695_vm0, %v693_v62  ;;  %vm807_vm0 = vcmask 1044416  }
 0x22b   : > { %704 = vst.msk [vmem:[#allocation4] sm:$0xf] %vm703_vm1, %v701_v61 }
 0x22d   : > { %v717_v63 = vpop.permute.xlu1 %716  ;;  %v709_v0 = vpop.permute.xlu0 %708 }
 0x22e   : > { %712 = vst.msk [vmem:[#allocation4] sm:$0xf] %vm711_vm9, %v709_v0 }
 0x22f   : > { %720 = vst.msk [vmem:[#allocation4] sm:$0xf] %vm719_vm10, %v717_v63 }
 0x231   : > { %v733_v1 = vpop.permute.xlu1 %732  ;;  %v725_v2 = vpop.permute.xlu0 %724 }
 0x232   : > { %728 = vst.msk [vmem:[#allocation4] sm:$0xf] %vm727_vm11, %v725_v2 }
 0x233   : > { %736 = vst.msk [vmem:[#allocation4] sm:$0xf] %vm735_vm12, %v733_v1 }
 0x235   : > { %v749_v3 = vpop.permute.xlu1 %748  ;;  %v741_v4 = vpop.permute.xlu0 %740 }
 0x236   : > { %744 = vst.msk [vmem:[#allocation4] sm:$0xf] %vm743_vm13, %v741_v4 }
 0x237   : > { %752 = vst.msk [vmem:[#allocation4] sm:$0xf] %vm751_vm14, %v749_v3 }
 0x239   : > { %v765_v5 = vpop.permute.xlu1 %764  ;;  %v757_v6 = vpop.permute.xlu0 %756 }
 0x23a   : > { %760 = vst.msk [vmem:[#allocation4] sm:$0xf] %vm759_vm15, %v757_v6 }
 0x23b   : > { %768 = vst.msk [vmem:[#allocation4] sm:$0xf] %vm767_vm2, %v765_v5 }
 0x23d   : > { %v781_v7 = vpop.permute.xlu1 %780  ;;  %v773_v8 = vpop.permute.xlu0 %772 }
 0x23e   : > { %776 = vst.msk [vmem:[#allocation4] sm:$0xf] %vm775_vm3, %v773_v8 }
 0x23f   : > { %784 = vst.msk [vmem:[#allocation4] sm:$0xf] %vm783_vm4, %v781_v7 }
 0x241   : > { %v797_v9 = vpop.permute.xlu1 %796  ;;  %v789_v10 = vpop.permute.xlu0 %788 }
 0x242   : > { %792 = vst.msk [vmem:[#allocation4] sm:$0xf] %vm791_vm6, %v789_v10 }
 0x243   : > { %800 = vst.msk [vmem:[#allocation4] sm:$0xf] %vm799_vm8, %v797_v9 }
 0x245   : > { %v805_v11 = vpop.permute.xlu0 %804 }
 0x246   : > { %808 = vst.msk [vmem:[#allocation4] sm:$0xf] %vm807_vm0, %v805_v11 }
 0x24d   : > { %v812_v12 = vld [vmem:[#allocation4] sm:$0xff] }
 0x24e   : > { %v909_v13 = vcombine.high %v812_v12, %v812_v12 }
 0x250   : > { %1151 = vmatprep.mubr.msk.f32.mxu1 %vm678_vm5, %v909_v13 }
 0x251   : > { %977 = vmatmul.mubr.f32.vlgmr.msra.gmra.mrb[0].mxu1 %v812_v12 }
 0x295   : > { %v904_v14 = vpop.f32.mrb[2].mxu0 }
 0x296   : > { %v1199_v15 = vpop.f32.mrb[3].mxu0 }
 0x324   : > { %v978_v16 = vpop.f32.mrb[0].mxu1 }
 0x325   : > { %v979_v18 = vadd.f32 %v978_v16, %v904_v14  ;;  %v980_v19 = vpop.f32.mrb[1].mxu1 }
 0x327   : > { %v989_v21 = vsub.f32 %v979_v18, %v1152_v17  ;;  %1000 = vst.msk [vmem:[%s349_s14] sm:$0xf] %vm687_vm7, %v979_v18 }
 0x328   : > { %1325 = shalt.err (!%p1322_p3)
}
 0x329   : > { %s1326_s28 = scalar_lea.hbm %s1723_s17, 64  ;;  %s1330_s25 = scalar_lea.hbm %s1817_s9, 128 }
 0x32a   : > { %p1327_p4 = scmp.ne.s32.totalorder %s1723_s17, %s1326_s28  ;;  %p1331_p9 = scmp.lt.u32.totalorder %s1723_s17, %s1817_s9 }
 0x32b   : > { %p1332_p10 = scmp.lt.u32.totalorder %s1330_s25, %s1326_s28  ;;  %p1334_p12 = scmp.lt.u32.totalorder %s1326_s28, %s1723_s17 }
 0x32c   : > { %p1328_p7 = pnand %p1327_p4, %p1524_p5 }
 0x32d   : > { %p1333_p11 = por %p1332_p10, %p1331_p9 }
 0x32e   : > { %p1329_p8 = pneg %p1328_p7 }
 0x32f   : > { %p1335_p13 = por %p1334_p12, %p1333_p11 }
 0x331   : > { %p1336_p0 = pnand %p1335_p13, %p1329_p8 }
 0x333   : > { %1339 = shalt.err (!%p1336_p0)
}
 0x334   : > { %1242 = dma.vmem_to_hbm [thread:$0]  (%p1524_p5), %s1725_s0, 64, %s1723_s17, %s1007_s26   ;;  %v997_v22 = vmul.f32 %v1153_v20, %v989_v21 }
 0x335   : > { %s1833_s16 = sshll.u32 %s1507_s13, 6  ;;  %s1834_s14 = sshll.u32 %s1730_s23, 4  ;;  %s1765_s14 = int_to_ptr.vmem [resolvable:$true] %s1834_s14 }
 0x336   : > { %v998_v23 = vmax.f32 %v997_v22, 0.0  ;;  %s1761_s28 = scalar_lea.hbm %s1816_s8, %s1833_s16  ;;  %s1002_s21 = scalar_lea.sflag [#allocation6], %s1711_s29 }
 0x337   : > { %s1340_s25 = scalar_lea.vmem %s1765_s14, 64  ;;  %s1435_s13 = smov [#allocation5]  }
 0x338   : > { %999 = vst.msk [vmem:[%s1730_s23] sm:$0xf] %vm687_vm7, %v998_v23  ;;  %p1341_p1 = scmp.ne.s32.totalorder %s1765_s14, %s1340_s25  ;;  %s1344_s0 = sshll.u32 %s1435_s13, 4  ;;  %s1345_s0 = int_to_ptr.vmem [resolvable:$false] %s1344_s0 }
 0x339   : > { %s1346_s17 = scalar_lea.vmem %s1345_s0, 128  ;;  %p1347_p4 = scmp.lt.s32.totalorder %s1765_s14, %s1345_s0 }
 0x33a   : > { %p1342_p2 = pnand %p1341_p1, %p1524_p5  ;;  %p1348_p7 = scmp.lt.s32.totalorder %s1346_s17, %s1340_s25 }
 0x33c   : > { %p1343_p3 = pneg %p1342_p2  ;;  %p1349_p8 = por %p1348_p7, %p1347_p4 }
 0x33e   : > { %p1350_p9 = pnand %p1349_p8, %p1343_p3 }
 0x340   : > { %1353 = shalt.err (!%p1350_p9)
}
 0x341   : > { %s1354_s29 = scalar_lea.hbm %s1761_s28, 64  ;;  %s1358_s22 = scalar_lea.hbm %s1816_s8, 128 }
 0x342   : > { %p1355_p10 = scmp.ne.s32.totalorder %s1761_s28, %s1354_s29  ;;  %p1359_p13 = scmp.lt.u32.totalorder %s1761_s28, %s1816_s8 }
 0x343   : > { %p1360_p0 = scmp.lt.u32.totalorder %s1358_s22, %s1354_s29  ;;  %p1362_p2 = scmp.lt.u32.totalorder %s1354_s29, %s1761_s28 }
 0x344   : > { %p1356_p11 = pnand %p1355_p10, %p1524_p5 }
 0x345   : > { %p1361_p1 = por %p1360_p0, %p1359_p13 }
 0x346   : > { %p1357_p12 = pneg %p1356_p11 }
 0x347   : > { %p1363_p3 = por %p1362_p2, %p1361_p1 }
 0x349   : > { %p1364_p4 = pnand %p1363_p3, %p1357_p12 }
 0x34b   : > { %1367 = shalt.err (!%p1364_p4)
}
 0x34c   : > { %1241 = dma.vmem_to_hbm [thread:$0]  (%p1524_p5), %s1765_s14, 64, %s1761_s28, %s1002_s21  }
 0x34d PF: > { %p1252_p7 = scmp.ge.s32.totalorder %s1406_s12, 2  ;;  %s1045_s27 = sand.u32 1, %s1394_s30  }
 0x34e   : > { %s1046_s25 = scalar_lea.sflag [#allocation6], %s1045_s27 }
 0x34f   : > { %p1246_p8 = pnand %p1252_p7, %p1528_p6 }
 0x351   : > { %1385 = dma.done.wait (!%p1246_p8), %s1046_s25, 64  }
 0x352   : > { %1387 = vsyncadd (!%p1246_p8), %s1046_s25, 4294967232  ;;  %s1055_s13 = scalar_lea.sflag [#allocation8], %s1045_s27 }
 0x353   : > { %1389 = dma.done.wait (!%p1246_p8), %s1055_s13, 64  }
 0x354   : > { %1391 = vsyncadd (!%p1246_p8), %s1055_s13, 4294967232  ;;  %p23_p5 = scmp.ge.s32.totalorder %s1511_s15, 4   ;;  %s1835_s30 = smov %s1398_s10 }
 0x355   : > { %s1836_s10 = smov %s1402_s11  ;;  %s1837_s11 = smov %s1522_s18 }
 0x356   : > { %s1838_s12 = smov %s1511_s15  ;;  %25 = sbr.rel (!%p23_p5) target bundleno = 7 (0x7), region = 123 }
 0x35d   :  { %1060 = vsyncpa [#allocation6], 1 }
 0x35e   :  { %1062 = vsyncpa [#allocation6 + $0x1], 1 }
 0x35f   :  { %1063 = vsyncpa [#allocation8], 1 }
 0x360   :  { %1065 = vsyncpa [#allocation8 + $0x1], 1 }

</bundles_post_ra>
